<compile_context>
chip_gen: v7x
topology: tpu7x:2x2x1
jax: 0.10.0
libtpu: 0.0.40
codegen_flags: <defaults>
</compile_context>

<pallas_src>
import jax
import jax.numpy as jnp
from jax.experimental import pallas as pl
from jax.experimental.pallas import tpu as pltpu


# ----------------------------- Pallas kernel ------------------------------ #
def _att_block_kernel(x_ref, g_ref, wx_ref, wg_ref, b_ref, wpsi_ref, bpsi_ref,
                      out_ref):
    # x_ref: (F_l, T) f32, g_ref: (F_g, T) f32   (spatial dim on lanes)
    x = x_ref[...]
    g = g_ref[...]

    # Two MXU matmuls contracting over channels, accumulated in f32.
    a = (jnp.dot(wx_ref[...], x, preferred_element_type=jnp.float32)
         + jnp.dot(wg_ref[...], g, preferred_element_type=jnp.float32)
         + b_ref[...])                                    # (F_int, T)
    a = jnp.maximum(a, 0.0)                               # ReLU (VPU, f32)

    # psi: 1-wide projection -> VPU multiply + sublane reduction (skip MXU).
    psi = jnp.sum(a * wpsi_ref[...], axis=0, keepdims=True) + bpsi_ref[...]

    # Sigmoid via EUP exp + approximate reciprocal (keeps the divide off VALU).
    psi = pl.reciprocal(1.0 + jnp.exp(-psi), approx=True)  # (1, T)

    # Gate the skip connection; lane-dense store (last dim = HW tile).
    out_ref[...] = (x * psi).astype(out_ref.dtype)


# ------------------------------ tiling logic ------------------------------- #
def _pick_hw_tile(HW, col_bytes, const_bytes, budget):
    """Largest power-of-two multiple of 128 (<= HW) that fits the VMEM budget.
    If HW <= 128, use the full spatial extent (satisfies the full-dim rule)."""
    if HW <= 128:
        return HW
    max_tile = (min(HW, 32768) // 128) * 128
    tile = 128
    while tile * 2 <= max_tile and const_bytes + (tile * 2) * col_bytes <= budget:
        tile *= 2
    return tile


def _att_block_nchw(x3, g3, wxT, wgT, b_col, wpsi_col, bpsi, *, out_dtype):
    """x3: (N, F_l, HW), g3: (N, F_g, HW) in f32; weights pre-folded (f32)."""
    N, F_l, HW = x3.shape
    _, F_g, _ = g3.shape
    F_int = wxT.shape[0]

    # Per-generation VMEM budget (v5e/v6e: 128 MiB, v7x: 64 MiB).
    try:
        vmem_cap = pltpu.get_tpu_info().vmem_capacity_bytes
    except Exception:
        vmem_cap = 64 * 1024 * 1024
    vmem_limit = min(int(0.75 * vmem_cap), 100 * 1024 * 1024)

    # f32 bytes per lane column: double-buffered x / g / out tiles plus the
    # f32 intermediates (a, relu(a) temp, psi).
    col_bytes = 4 * (2 * F_l + 2 * F_g + 2 * F_l + 2 * F_int + 2)
    # Constant-index weight/bias blocks (counted double-buffered, conservative).
    const_bytes = 4 * 2 * (F_int * (F_l + F_g) + 3 * F_int + 1)
    tile = _pick_hw_tile(HW, col_bytes, const_bytes, int(0.6 * vmem_limit))

    grid = (N, pl.cdiv(HW, tile))   # partial last HW block is masked by Pallas

    def _const(shape):
        return pl.BlockSpec(shape, lambda n, t: (0, 0))

    return pl.pallas_call(
        _att_block_kernel,
        out_shape=jax.ShapeDtypeStruct((N, F_l, HW), out_dtype),
        grid=grid,
        in_specs=[
            pl.BlockSpec((None, F_l, tile), lambda n, t: (n, 0, t)),   # x block
            pl.BlockSpec((None, F_g, tile), lambda n, t: (n, 0, t)),   # g block
            _const((F_int, F_l)),                                      # Wx^T
            _const((F_int, F_g)),                                      # Wg^T
            _const((F_int, 1)),                                        # fused bias
            _const((F_int, 1)),                                        # psi weight
            _const((1, 1)),                                            # psi bias
        ],
        out_specs=pl.BlockSpec((None, F_l, tile), lambda n, t: (n, 0, t)),
        compiler_params=pltpu.CompilerParams(
            dimension_semantics=("parallel", "parallel"),
            vmem_limit_bytes=vmem_limit),
    )(x3, g3, wxT, wgT, b_col, wpsi_col, bpsi)


# ------------------------------ JAX wrapper -------------------------------- #
def _fold_bn(w, b, gamma, beta, mean, var, eps=1e-5):
    """Fold eval-mode BatchNorm into a 1x1 conv weight/bias.
    w: (Cin, Cout), b: (Cout,), BN params: (Cout,).  Returns (Cin,Cout),(1,Cout)."""
    scale = gamma / jnp.sqrt(var + eps)
    w_f = w * scale[None, :]
    b_f = (b - mean) * scale + beta
    return w_f, b_f.reshape(1, -1)


def att_block(g, x, params):
    """g: (N, F_g, H, W), x: (N, F_l, H, W)  (NCHW, matching PyTorch)."""
    N, F_g, H, W = g.shape
    _, F_l, _, _ = x.shape
    HW = H * W

    wg, bg = _fold_bn(params["wg"], params["bg"], *params["bn_g"])
    wx, bx = _fold_bn(params["wx"], params["bx"], *params["bn_x"])
    wpsi, bpsi = _fold_bn(params["wpsi"], params["bpsi"], *params["bn_psi"])

    wxT = wx.T.astype(jnp.float32)                      # (F_int, F_l)
    wgT = wg.T.astype(jnp.float32)                      # (F_int, F_g)
    b_col = (bx + bg).reshape(-1, 1).astype(jnp.float32)    # (F_int, 1)
    wpsi_col = wpsi.astype(jnp.float32)                 # (F_int, 1)
    bpsi = bpsi.reshape(1, 1).astype(jnp.float32)       # (1, 1)

    # Free metadata reshapes (NCHW is contiguous) — no HBM traffic.
    x3 = x.astype(jnp.float32).reshape(N, F_l, HW)
    g3 = g.astype(jnp.float32).reshape(N, F_g, HW)

    out3 = _att_block_nchw(x3, g3, wxT, wgT, b_col, wpsi_col, bpsi,
                           out_dtype=x.dtype)
    return out3.reshape(N, F_l, H, W)


# ------------------------------ reference ---------------------------------- #
def att_block_reference(g, x, params, eps=1e-5):
    """Pure-JAX f32 reference (1x1 conv + eval-mode BN), NCHW."""
    def branch(t, w, b, bn):
        gamma, beta, mean, var = bn
        y = jnp.einsum("nchw,co->nohw", t, w) + b[None, :, None, None]
        y = (y - mean[None, :, None, None]) / jnp.sqrt(var + eps)[None, :, None, None]
        return y * gamma[None, :, None, None] + beta[None, :, None, None]

    g1 = branch(g, params["wg"], params["bg"], params["bn_g"])
    x1 = branch(x, params["wx"], params["bx"], params["bn_x"])
    a = jnp.maximum(g1 + x1, 0.0)
    psi = branch(a, params["wpsi"], params["bpsi"], params["bn_psi"])
    psi = jax.nn.sigmoid(psi)
    return x * psi


def make_params(key, F_g, F_l, F_int):
    ks = jax.random.split(key, 18)

    def bn(k1, k2, k3, k4, n):
        gamma = 1.0 + 0.1 * jax.random.normal(k1, (n,), jnp.float32)
        beta = 0.1 * jax.random.normal(k2, (n,), jnp.float32)
        mean = 0.1 * jax.random.normal(k3, (n,), jnp.float32)
        var = jnp.abs(0.5 + 0.1 * jax.random.normal(k4, (n,), jnp.float32))
        return (gamma, beta, mean, var)

    return {
        "wg": 0.3 * jax.random.normal(ks[0], (F_g, F_int), jnp.float32),
        "bg": 0.1 * jax.random.normal(ks[1], (F_int,), jnp.float32),
        "wx": 0.3 * jax.random.normal(ks[2], (F_l, F_int), jnp.float32),
        "bx": 0.1 * jax.random.normal(ks[3], (F_int,), jnp.float32),
        "wpsi": 0.3 * jax.random.normal(ks[4], (F_int, 1), jnp.float32),
        "bpsi": 0.1 * jax.random.normal(ks[5], (1,), jnp.float32),
        "bn_g": bn(ks[6], ks[7], ks[8], ks[9], F_int),
        "bn_x": bn(ks[10], ks[11], ks[12], ks[13], F_int),
        "bn_psi": bn(ks[14], ks[15], ks[16], ks[17], 1),
    }


if __name__ == "__main__":
    key = jax.random.PRNGKey(0)
    N, F_g, F_l, F_int, H, W = 2, 4, 4, 8, 16, 16

    kg, kx, kp = jax.random.split(key, 3)
    g = jax.random.normal(kg, (N, F_g, H, W), jnp.float32)
    x = jax.random.normal(kx, (N, F_l, H, W), jnp.float32)
    params = make_params(kp, F_g, F_l, F_int)

    out = jax.block_until_ready(att_block(g, x, params))
    ref = jax.block_until_ready(att_block_reference(g, x, params))

    assert out.shape == (N, F_l, H, W)
    assert out.dtype == x.dtype
    # f32 end-to-end; only the approx reciprocal in the sigmoid adds error.
    assert jnp.allclose(out, ref, atol=2e-2, rtol=2e-2), float(
        jnp.max(jnp.abs(out - ref)))
    print("KERNEL_OK")
</pallas_src>

<mosaic_0001>
module attributes {stable_mosaic.version = 11 : i64} {
  func.func @_att_block_kernel(%arg0: i32, %arg1: i32, %arg2: memref<1x4x256xf32, #tpu.memory_space<vmem>>, %arg3: memref<1x4x256xf32, #tpu.memory_space<vmem>>, %arg4: memref<8x4xf32, #tpu.memory_space<vmem>>, %arg5: memref<8x4xf32, #tpu.memory_space<vmem>>, %arg6: memref<8x1xf32, #tpu.memory_space<vmem>>, %arg7: memref<8x1xf32, #tpu.memory_space<vmem>>, %arg8: memref<1x1xf32, #tpu.memory_space<vmem>>, %arg9: memref<1x4x256xf32, #tpu.memory_space<vmem>>) attributes {dimension_semantics = [#tpu.dimension_semantics<parallel>, #tpu.dimension_semantics<parallel>], iteration_bounds = array<i64: 2, 1>, scalar_prefetch = 0 : i64, scratch_operands = 0 : i64, tpu.core_type = #tpu.core_type<tc>, window_params = [{transform_indices = @transform_0, window_bounds = array<i64: 1, 4, 256>}, {transform_indices = @transform_1, window_bounds = array<i64: 1, 4, 256>}, {pipeline_mode = #tpu.pipeline_mode<synchronous>, transform_indices = @transform_2, window_bounds = array<i64: 8, 4>}, {pipeline_mode = #tpu.pipeline_mode<synchronous>, transform_indices = @transform_3, window_bounds = array<i64: 8, 4>}, {pipeline_mode = #tpu.pipeline_mode<synchronous>, transform_indices = @transform_4, window_bounds = array<i64: 8, 1>}, {pipeline_mode = #tpu.pipeline_mode<synchronous>, transform_indices = @transform_5, window_bounds = array<i64: 8, 1>}, {pipeline_mode = #tpu.pipeline_mode<synchronous>, transform_indices = @transform_6, window_bounds = array<i64: 1, 1>}, {transform_indices = @transform_7, window_bounds = array<i64: 1, 4, 256>}]} {
    %c0 = arith.constant 0 : index
    %c0_0 = arith.constant 0 : index
    %c0_1 = arith.constant 0 : index
    %0 = vector.load %arg2[%c0, %c0_0, %c0_1] : memref<1x4x256xf32, #tpu.memory_space<vmem>>, vector<1x4x256xf32>
    %1 = vector.shape_cast %0 : vector<1x4x256xf32> to vector<4x256xf32>
    %c0_2 = arith.constant 0 : index
    %c0_3 = arith.constant 0 : index
    %c0_4 = arith.constant 0 : index
    %2 = vector.load %arg3[%c0_2, %c0_3, %c0_4] : memref<1x4x256xf32, #tpu.memory_space<vmem>>, vector<1x4x256xf32>
    %3 = vector.shape_cast %2 : vector<1x4x256xf32> to vector<4x256xf32>
    %c0_5 = arith.constant 0 : index
    %c0_6 = arith.constant 0 : index
    %4 = vector.load %arg4[%c0_5, %c0_6] : memref<8x4xf32, #tpu.memory_space<vmem>>, vector<8x4xf32>
    %cst = arith.constant dense<0.000000e+00> : vector<8x256xf32>
    %5 = tpu.matmul %4, %1, %cst {dimension_numbers = #tpu.dot_dimension_numbers<[1], [0], [0], [1], [0, 0, 1, 1], [], []>} : vector<8x4xf32>, vector<4x256xf32>, vector<8x256xf32> -> vector<8x256xf32>
    %c0_7 = arith.constant 0 : index
    %c0_8 = arith.constant 0 : index
    %6 = vector.load %arg5[%c0_7, %c0_8] : memref<8x4xf32, #tpu.memory_space<vmem>>, vector<8x4xf32>
    %cst_9 = arith.constant dense<0.000000e+00> : vector<8x256xf32>
    %7 = tpu.matmul %6, %3, %cst_9 {dimension_numbers = #tpu.dot_dimension_numbers<[1], [0], [0], [1], [0, 0, 1, 1], [], []>} : vector<8x4xf32>, vector<4x256xf32>, vector<8x256xf32> -> vector<8x256xf32>
    %8 = arith.addf %5, %7 : vector<8x256xf32>
    %c0_10 = arith.constant 0 : index
    %c0_11 = arith.constant 0 : index
    %9 = vector.load %arg6[%c0_10, %c0_11] : memref<8x1xf32, #tpu.memory_space<vmem>>, vector<8x1xf32>
    %10 = vector.broadcast %9 : vector<8x1xf32> to vector<8x256xf32>
    %11 = arith.addf %8, %10 : vector<8x256xf32>
    %cst_12 = arith.constant 0.000000e+00 : f32
    %12 = vector.broadcast %cst_12 : f32 to vector<8x256xf32>
    %13 = arith.maximumf %11, %12 : vector<8x256xf32>
    %c0_13 = arith.constant 0 : index
    %c0_14 = arith.constant 0 : index
    %14 = vector.load %arg7[%c0_13, %c0_14] : memref<8x1xf32, #tpu.memory_space<vmem>>, vector<8x1xf32>
    %15 = vector.broadcast %14 : vector<8x1xf32> to vector<8x256xf32>
    %16 = arith.mulf %13, %15 : vector<8x256xf32>
    %cst_15 = arith.constant dense<0.000000e+00> : vector<256xf32>
    %17 = vector.multi_reduction <add>, %16, %cst_15 [0] : vector<8x256xf32> to vector<256xf32>
    %18 = vector.shape_cast %17 : vector<256xf32> to vector<1x256xf32>
    %c0_16 = arith.constant 0 : index
    %c0_17 = arith.constant 0 : index
    %19 = vector.load %arg8[%c0_16, %c0_17] : memref<1x1xf32, #tpu.memory_space<vmem>>, vector<1x1xf32>
    %20 = vector.broadcast %19 : vector<1x1xf32> to vector<1x256xf32>
    %21 = arith.addf %18, %20 : vector<1x256xf32>
    %cst_18 = arith.constant 0.000000e+00 : f32
    %22 = vector.broadcast %cst_18 : f32 to vector<1x256xf32>
    %23 = arith.subf %22, %21 : vector<1x256xf32>
    %24 = math.exp %23 : vector<1x256xf32>
    %cst_19 = arith.constant 1.000000e+00 : f32
    %25 = vector.broadcast %cst_19 : f32 to vector<1x256xf32>
    %26 = arith.addf %25, %24 : vector<1x256xf32>
    %27 = tpu.reciprocal %26 {approx = true} : vector<1x256xf32> -> vector<1x256xf32>
    %28 = vector.broadcast %27 : vector<1x256xf32> to vector<4x256xf32>
    %29 = arith.mulf %1, %28 : vector<4x256xf32>
    %c0_20 = arith.constant 0 : index
    %c0_21 = arith.constant 0 : index
    %c0_22 = arith.constant 0 : index
    %30 = vector.load %arg9[%c0_20, %c0_21, %c0_22] : memref<1x4x256xf32, #tpu.memory_space<vmem>>, vector<1x4x256xf32>
    %31 = vector.shape_cast %30 : vector<1x4x256xf32> to vector<4x256xf32>
    %32 = vector.shape_cast %29 : vector<4x256xf32> to vector<1x4x256xf32>
    tpu.vector_store %arg9[%c0_20, %c0_21, %c0_22], %32 {strides = array<i32>} : memref<1x4x256xf32, #tpu.memory_space<vmem>>, vector<1x4x256xf32>,
    return
  }
  func.func @transform_0(%arg0: i32, %arg1: i32) -> (i32, i32, i32) {
    %c0_i32 = arith.constant 0 : i32
    %c0_i32_0 = arith.constant 0 : i32
    return %arg0, %c0_i32, %arg1 : i32, i32, i32
  }
  func.func @transform_1(%arg0: i32, %arg1: i32) -> (i32, i32, i32) {
    %c0_i32 = arith.constant 0 : i32
    %c0_i32_0 = arith.constant 0 : i32
    return %arg0, %c0_i32, %arg1 : i32, i32, i32
  }
  func.func @transform_2(%arg0: i32, %arg1: i32) -> (i32, i32) {
    %c0_i32 = arith.constant 0 : i32
    %c0_i32_0 = arith.constant 0 : i32
    %c0_i32_1 = arith.constant 0 : i32
    return %c0_i32, %c0_i32_0 : i32, i32
  }
  func.func @transform_3(%arg0: i32, %arg1: i32) -> (i32, i32) {
    %c0_i32 = arith.constant 0 : i32
    %c0_i32_0 = arith.constant 0 : i32
    %c0_i32_1 = arith.constant 0 : i32
    return %c0_i32, %c0_i32_0 : i32, i32
  }
  func.func @transform_4(%arg0: i32, %arg1: i32) -> (i32, i32) {
    %c0_i32 = arith.constant 0 : i32
    %c0_i32_0 = arith.constant 0 : i32
    %c0_i32_1 = arith.constant 0 : i32
    return %c0_i32, %c0_i32_0 : i32, i32
  }
  func.func @transform_5(%arg0: i32, %arg1: i32) -> (i32, i32) {
    %c0_i32 = arith.constant 0 : i32
    %c0_i32_0 = arith.constant 0 : i32
    %c0_i32_1 = arith.constant 0 : i32
    return %c0_i32, %c0_i32_0 : i32, i32
  }
  func.func @transform_6(%arg0: i32, %arg1: i32) -> (i32, i32) {
    %c0_i32 = arith.constant 0 : i32
    %c0_i32_0 = arith.constant 0 : i32
    %c0_i32_1 = arith.constant 0 : i32
    return %c0_i32, %c0_i32_0 : i32, i32
  }
  func.func @transform_7(%arg0: i32, %arg1: i32) -> (i32, i32, i32) {
    %c0_i32 = arith.constant 0 : i32
    %c0_i32_0 = arith.constant 0 : i32
    return %arg0, %c0_i32, %arg1 : i32, i32, i32
  }
}

</mosaic_0001>

<bundles_post_ra>
// kernel: tpu_custom_call.1
= control target key start
LH: loop header
LB: loop body
LE: loop exit
PB: predicated region body
PF: predicated region fallthrough
CT: control target
= control target key end

     0   :  { %s1035_s0 = inlined_call_operand.vmem [shape: f32[2,4,256], index: 0, kind: input, shape index: {}]   ;;  %s1036_s1 = inlined_call_operand.vmem [shape: f32[2,4,256], index: 1, kind: input, shape index: {}]   ;;  %s1037_s2 = inlined_call_operand.vmem [shape: f32[8,4], index: 2, kind: input, shape index: {}]   ;;  %s1038_s3 = inlined_call_operand.vmem [shape: f32[8,4], index: 3, kind: input, shape index: {}]   ;;  %s1039_s4 = inlined_call_operand.vmem [shape: f32[8,1], index: 4, kind: input, shape index: {}]   ;;  %s1040_s5 = inlined_call_operand.vmem [shape: f32[8,1], index: 5, kind: input, shape index: {}]   ;;  %s1041_s6 = inlined_call_operand.<no memory space> [shape: f32[1,1], index: 6, kind: input, shape index: {}]   ;;  %s1042_s7 = inlined_call_operand.hbm [shape: f32[2,4,256], index: 7, kind: output, shape index: {}]  }
   0x1   :  { %v12_v0 = vstv %s1041_s6 }
   0x2   :  { %13 = vst [vmem:[#allocation2] sm:$0x1] %v12_v0 }
   0x3   :  { %14 = vsyncpa [#allocation4], 0 }
   0x4   :  { %16 = vsyncpa [#allocation4 + $0x1], 0  ;;  %s902_s26 = smov 0   ;;  %s904_s27 = smov 0  }
   0x5   :  { %s906_s28 = smov 0   ;;  %s908_s29 = smov 0  }
   0x6   :  { %s910_s30 = smov 0   ;;  %s912_s8 = smov 0  }
   0x7 LB: > { %s681_s6 = sadd.s32 4294967295, %s854_s8   ;;  %s682_s9 = sadd.s32 4294967294, %s854_s8   ;;  %s854_s8 = sphi %s912_s8, %s22_s8   ;;  %s850_s30 = sphi %s910_s30, %s1049_s30   ;;  %s846_s29 = sphi %s908_s29, %s1048_s29   ;;  %s842_s28 = sphi %s906_s28, %s1047_s28   ;;  %s838_s27 = sphi %s904_s27, %s1046_s27   ;;  %s834_s26 = sphi %s902_s26, %s1045_s26  }
   0x8   : > { %s34_s10 = sadd.s32 1, %s850_s30  ;;  %s204_s11 = sadd.s32 1, %s842_s28 }
   0x9   : > { %p36_p0 = scmp.ge.s32.totalorder %s34_s10, 2  ;;  %p214_p1 = scmp.ne.s32.totalorder %s842_s28, %s838_s27 }
   0xa   : > { %p215_p2 = scmp.eq.s32.totalorder %s681_s6, 1  ;;  %p220_p3 = scmp.ne.s32.totalorder %s838_s27, %s834_s26 }
   0xb   : > { %s1051_s10 = smov (%p36_p0, %s34_s10), 0  ;;  %p221_p5 = scmp.eq.s32.totalorder %s682_s9, 1 }
   0xc   : > { %p942_p4 = por %p215_p2, %p214_p1  ;;  %s199_s13 = ssub.s32 %s850_s30, %s1051_s10 }
   0xd   : > { %p685_p6 = scmp.ge.s32.totalorder %s854_s8, 1  ;;  %p202_p7 = scmp.eq.s32.totalorder %s199_s13, 0 }
   0xe   : > { %p949_p8 = por %p221_p5, %p220_p3  ;;  %p280_p9 = scmp.lt.s32.totalorder %s854_s8, 3 }
   0xf   : > { %s955_s15 = scalar_select %p202_p7, %s842_s28, %s204_s11  }
  0x10   : > { %p281_p10 = pnand %p685_p6, %p280_p9 }
  0x11   : > { %p326_p11 = scmp.lt.s32.totalorder (!%p281_p10), %s846_s29, 1  ;;  %v856_v1 = vmov (!%p281_p10), 0.0   ;;  %v512_v2 = vld [vmem:[%s1039_s4] sm:$0xff] (!%p281_p10)  ;;  %v857_v4 = vmov (!%p281_p10), 0   ;;  %vm356_vm0 = vcmask (!%p281_p10), 1043456   ;;  %vm352_vm1 = vcmask (!%p281_p10), 31744  }
  0x12   : > { %284 = sbr.rel (%p281_p10) target bundleno = 316 (0x13c), region = 48  ;;  %425 = vmatprep.mubr.f32.mxu1 (!%p281_p10), %v856_v1  ;;  %505 = vmatprep.mubr.f32.mxu0 (!%p281_p10), %v856_v1  ;;  %v542_v3 = vld [vmem:[#allocation2] sm:$0x1] (!%p281_p10)  ;;  %v548_v22 = vlaneseq (!%p281_p10)  ;;  %s704_s20 = sshll.u32 (!%p281_p10), %s846_s29, 7 }
  0x13   : > { %764 = vset.pattern.permute.xlu0 (!%p281_p10), %v857_v4  ;;  %765 = vset.pattern.permute.xlu1 (!%p281_p10), %v857_v4  ;;  %v522_v5 = vld [vmem:[%s1040_s5] sm:$0xff] (!%p281_p10)  ;;  %s988_s25 = scalar_lea.hbm (!%p281_p10), %s1042_s7, %s704_s20 }
  0x14   : > { %515 = vperm.xlu0 (!%p281_p10), %764, %v512_v2   ;;  %545 = vperm.xlu1 (!%p281_p10), %765, %v542_v3   ;;  %v349_v10 = vld [vmem:[%s1038_s3] sm:$0xff] (!%p281_p10)  ;;  %v549_v28 = vshrl.u32 (!%p281_p10), %v548_v22, 7 }
  0x15   : > { %v348_v11 = vld [vmem:[%s1037_s2] sm:$0xff] (!%p281_p10) }
  0x16   : > { %v550_v33 = vsub.s32 (!%p281_p10), 0, %v549_v28 }
  0x18   : > { %525 = vperm.xlu0 (!%p281_p10), %764, %v522_v5  }
  0x19   : > { %s327_s18 = scalar_select %p326_p11, %s846_s29, 1 }
  0x1a   : > { %s858_s29 = smov [#allocation3]  }
  0x1b   : > { %s702_s19 = sshll.u32 %s327_s18, 3  ;;  %s322_s18 = sand.u32 1, %s838_s27  }
  0x1c   : > { %s343_s24 = scalar_lea.vmem %s1036_s1, %s702_s19  ;;  %s333_s9 = scalar_lea.vmem %s1035_s0, %s702_s19 }
  0x1d   : > { %v347_v6 = vld [vmem:[%s343_s24] sm:$0xff]  ;;  %s686_s19 = sshll.u32 %s322_s18, 3  ;;  %s571_s6 = scalar_lea.sflag [#allocation4], %s322_s18 }
  0x1e   : > { %v971_v7 = vld [vmem:[%s333_s9] sm:$0xff]  ;;  %v351_v8 = vcombine.high %v347_v6, %v347_v6  ;;  %s324_s21 = scalar_lea.vmem [#allocation3], %s686_s19  ;;  %s780_s11 = sshll.u32 %s858_s29, 4  ;;  %s781_s11 = int_to_ptr.vmem [resolvable:$false] %s780_s11 }
  0x1f   : > { %v433_v9 = vcombine.high %v971_v7, %v971_v7  ;;  %s587_s22 = sshll.u32 %s324_s21, 4  ;;  %s782_s13 = scalar_lea.vmem %s781_s11, 256  ;;  %s990_s22 = int_to_ptr.vmem [resolvable:$true] %s587_s22 }
  0x20   : > { %691 = vmatprep.subr.msk.mxu1 %vm356_vm0, %v351_v8  ;;  %s776_s9 = scalar_lea.vmem %s990_s22, 128  ;;  %p783_p1 = scmp.lt.s32.totalorder %s990_s22, %s781_s11 }
  0x21   : > { %694 = vmatprep.subr.msk.mxu0 %vm356_vm0, %v433_v9  ;;  %692 = vmatpush1.msk.msra.mxu1 %vm356_vm0, %v347_v6  ;;  %p777_p12 = scmp.ne.s32.totalorder %s990_s22, %s776_s9  ;;  %p784_p2 = scmp.lt.s32.totalorder %s782_s13, %s776_s9 }
  0x22   : > { %695 = vmatpush1.msk.msra.mxu0 %vm356_vm0, %v971_v7  ;;  %693 = vmatmul.mubr.msk.f32.vlgmr.msra.gmra.mrb[0].mxu1 %vm352_vm1, %v349_v10 }
  0x23   : > { %696 = vmatmul.mubr.msk.f32.vlgmr.msra.gmra.mrb[0].mxu0 %vm352_vm1, %v348_v11  ;;  %p778_p13 = pnand %p777_p12, %p942_p4  ;;  %p785_p3 = por %p784_p2, %p783_p1 }
  0x25   : > { %p779_p0 = pneg %p778_p13 }
  0x27   : > { %p786_p5 = pnand %p785_p3, %p779_p0 }
  0x93   : > { %v516_v12 = vpop.permute.xlu0 %515  ;;  %v546_v35 = vpop.permute.xlu1 %545 }
  0x94   : > { %v551_v39 = vrot.slane %v546_v35, %v550_v33 }
  0x97   : > { %v526_v23 = vpop.permute.xlu0 %525 }
  0xf5   : > { %v427_v13 = vpop.f32.mrb[0].mxu1 }
  0xf6   : > { %v507_v14 = vpop.f32.mrb[0].mxu0  ;;  %v429_v16 = vpop.f32.mrb[1].mxu1 }
  0xf7   : > { %v508_v15 = vadd.f32 %v507_v14, %v427_v13  ;;  %v509_v17 = vpop.f32.mrb[1].mxu0 }
  0xf8   : > { %v510_v18 = vadd.f32 %v509_v17, %v429_v16 }
  0xf9   : > { %v518_v19 = vadd.f32 %v516_v12, %v508_v15 }
  0xfa   : > { %v519_v20 = vadd.f32 %v516_v12, %v510_v18 }
  0xfb   : > { %v520_v21 = vmax.f32 %v518_v19, 0.0 }
  0xfc   : > { %v521_v24 = vmax.f32 %v519_v20, 0.0 }
  0xfd   : > { %v528_v25 = vmul.f32 %v526_v23, %v520_v21 }
  0xfe   : > { %v529_v26 = vmul.f32 %v526_v23, %v521_v24 }
  0xff   : > { %v530_v27 = vrot.slane %v528_v25, 4 }
 0x100   : > { %v536_v29 = vrot.slane %v529_v26, 4 }
 0x101   : > { %v531_v30 = vadd.f32 %v530_v27, %v528_v25 }
 0x102   : > { %v537_v31 = vadd.f32 %v536_v29, %v529_v26 }
 0x103   : > { %v532_v32 = vrot.slane %v531_v30, 2 }
 0x104   : > { %v538_v34 = vrot.slane %v537_v31, 2 }
 0x105   : > { %v533_v36 = vadd.f32 %v532_v32, %v531_v30 }
 0x106   : > { %v539_v37 = vadd.f32 %v538_v34, %v537_v31 }
 0x107   : > { %v534_v38 = vrot.slane %v533_v36, 1 }
 0x108   : > { %v540_v40 = vrot.slane %v539_v37, 1 }
 0x109   : > { %v535_v41 = vadd.f32 %v534_v38, %v533_v36 }
 0x10a   : > { %v541_v42 = vadd.f32 %v540_v40, %v539_v37 }
 0x10b   : > { %v552_v43 = vadd.f32 %v551_v39, %v535_v41 }
 0x10c   : > { %v553_v44 = vadd.f32 %v551_v39, %v541_v42 }
 0x10d   : > { %v554_v45 = vsub.f32 0.0, %v552_v43 }
 0x10e   : > { %v555_v46 = vsub.f32 0.0, %v553_v44 }
 0x10f   : > { %v556_v47 = vmul.f32 1.442695, %v554_v45 }
 0x110   : > { %v558_v48 = vmul.f32 1.442695, %v555_v46 }
 0x111   : > { %768 = vpow2.f32 %v556_v47 }
 0x112   : > { %770 = vpow2.f32 %v558_v48 }
 0x11b   : > { %v769_v49 = vpop.eup %768 }
 0x11c   : > { %v771_v50 = vpop.eup %770  ;;  %v560_v51 = vadd.f32 1.0, %v769_v49 }
 0x11d   : > { %v561_v52 = vadd.f32 1.0, %v771_v50 }
 0x11e   : > { %772 = vrcp.f32 %v560_v51 }
 0x11f   : > { %774 = vrcp.f32 %v561_v52 }
 0x128   : > { %v773_v53 = vpop.eup %772 }
 0x129   : > { %v775_v54 = vpop.eup %774 }
 0x12a   : > { %v566_v55 = vcombine.low %v773_v53, %v775_v54 }
 0x12c   : > { %v568_v56 = vmul.f32 %v566_v55, %v971_v7 }
 0x12e   : > { %569 = vst [vmem:[%s324_s21] sm:$0xff] %v568_v56 }
 0x12f   : > { %789 = shalt.err (!%p786_p5)
}
 0x130   : > { %s790_s16 = scalar_lea.hbm %s988_s25, 128  ;;  %s794_s19 = scalar_lea.hbm %s1042_s7, 256 }
 0x131   : > { %p791_p6 = scmp.ne.s32.totalorder %s988_s25, %s790_s16  ;;  %p795_p10 = scmp.lt.u32.totalorder %s988_s25, %s1042_s7 }
 0x132   : > { %p796_p11 = scmp.lt.u32.totalorder %s794_s19, %s790_s16  ;;  %p798_p13 = scmp.lt.u32.totalorder %s790_s16, %s988_s25 }
 0x133   : > { %p792_p7 = pnand %p791_p6, %p942_p4 }
 0x134   : > { %p797_p12 = por %p796_p11, %p795_p10 }
 0x135   : > { %p793_p9 = pneg %p792_p7 }
 0x136   : > { %p799_p0 = por %p798_p13, %p797_p12 }
 0x138   : > { %p800_p1 = pnand %p799_p0, %p793_p9 }
 0x13a   : > { %803 = shalt.err (!%p800_p1)
}
 0x13b   : > { %707 = dma.vmem_to_hbm [thread:$0]  (%p942_p4), %s990_s22, 128, %s988_s25, %s571_s6  }
 0x13c PF: > { %p713_p2 = scmp.ge.s32.totalorder %s854_s8, 2  ;;  %s599_s23 = sand.u32 1, %s834_s26  }
 0x13d   : > { %s600_s24 = scalar_lea.sflag [#allocation4], %s599_s23 }
 0x13e   : > { %p710_p3 = pnand %p713_p2, %p949_p8 }
 0x140   : > { %829 = dma.done.wait (!%p710_p3), %s600_s24, 128  }
 0x141   : > { %831 = vsyncadd (!%p710_p3), %s600_s24, 4294967168  ;;  %s22_s8 = sadd.s32 1, %s854_s8   ;;  %s1045_s26 = smov %s838_s27 }
 0x142   : > { %p19_p5 = scmp.ge.s32.totalorder %s22_s8, 4   ;;  %s1046_s27 = smov %s842_s28 }
 0x143   : > { %s1047_s28 = smov %s955_s15  ;;  %s1048_s29 = smov %s850_s30 }
 0x144   : > { %s1049_s30 = smov %s1051_s10  ;;  %21 = sbr.rel (!%p19_p5) target bundleno = 7 (0x7), region = 86 }
 0x14b   :  { %605 = vsyncpa [#allocation4], 1 }
 0x14c   :  { %607 = vsyncpa [#allocation4 + $0x1], 1 }

</bundles_post_ra>
